<compile_context>
chip_gen: v5e
topology: v5e:2x2
jax: 0.10.0
libtpu: 0.0.40
codegen_flags: <defaults>
</compile_context>

<pallas_src>
import functools

import jax
import jax.numpy as jnp
from jax.experimental import pallas as pl
from jax.experimental.pallas import tpu as pltpu


# ---------------------------------------------------------------------------
# Kernel: one fused batch tile of  sigmoid(relu(x @ W1 + b1) @ W2 + b2)
# ---------------------------------------------------------------------------
def mlp_kernel(x_ref, w1_ref, b1_ref, w2_ref, b2_ref, o_ref):
    # In-kernel bf16 cast of x (VPU) -- avoids a wrapper-side convert that
    # would re-read/re-write x in HBM before the pallas_call.
    x = x_ref[...].astype(jnp.bfloat16)
    # fc1: bf16 MXU matmul, f32 accumulation; bias + ReLU in f32 (lane-dense,
    # H is padded to a multiple of 128).
    h = jnp.dot(x, w1_ref[...], preferred_element_type=jnp.float32)
    h = jnp.maximum(h + b1_ref[...], 0.0)               # b1 is (1, H_pad), broadcasts
    # fc2: bf16 MXU matmul with 128-aligned K; epilogue stays f32.
    y = jnp.dot(h.astype(jnp.bfloat16), w2_ref[...],
                preferred_element_type=jnp.float32)
    y = y + b2_ref[...]
    # sigmoid(y) = 1 / (1 + exp(-y)); exp and reciprocal both on the EUP slot.
    e = jnp.exp(-y)
    o_ref[...] = pl.reciprocal(1.0 + e, approx=True).astype(o_ref.dtype)


# ---------------------------------------------------------------------------
# One-time parameter preparation (hoisted out of the per-call path)
# ---------------------------------------------------------------------------
def _ceil_to(v, m):
    return -(-int(v) // m) * m


def prepare_params(w1, b1, w2, b2):
    """Convert PyTorch nn.Linear layout ((out,in) weights, (out,) biases) to
    kernel layout ONCE:  W as (in, out_padded) bf16, biases as (1, out_padded)
    f32, with hidden and output dims zero-padded to multiples of 128 so the
    kernel's vregs and output stores are lane-dense.  Zero padding is inert
    through ReLU and the second matmul; the wrapper slices real D_out back out."""
    w1 = jnp.asarray(w1, jnp.float32)
    b1 = jnp.asarray(b1, jnp.float32)
    w2 = jnp.asarray(w2, jnp.float32)
    b2 = jnp.asarray(b2, jnp.float32)
    h, d_in = w1.shape
    d_out, _ = w2.shape
    h_pad = _ceil_to(h, 128)
    d_out_pad = _ceil_to(d_out, 128)

    w1_t = jnp.zeros((d_in, h_pad), jnp.bfloat16)
    w1_t = w1_t.at[:, :h].set(w1.T.astype(jnp.bfloat16))            # (D_in, H_pad)
    b1_2d = jnp.zeros((1, h_pad), jnp.float32).at[:, :h].set(b1.reshape(1, -1))

    w2_t = jnp.zeros((h_pad, d_out_pad), jnp.bfloat16)
    w2_t = w2_t.at[:h, :d_out].set(w2.T.astype(jnp.bfloat16))       # (H_pad, D_pad)
    b2_2d = jnp.zeros((1, d_out_pad), jnp.float32).at[:, :d_out].set(b2.reshape(1, -1))

    return w1_t, b1_2d, w2_t, b2_2d, d_out


# ---------------------------------------------------------------------------
# VMEM budgeting / generation-aware tiling helpers
# ---------------------------------------------------------------------------
def _padded_tile_bytes(rows, cols, itemsize):
    sublane = 32 // itemsize                 # 8 for f32, 16 for bf16
    return _ceil_to(max(rows, 1), sublane) * _ceil_to(max(cols, 1), 128) * itemsize


def _vmem_need_bytes(tb, d_in, h_pad, d_out_pad):
    x_tile = _padded_tile_bytes(tb, d_in, 4)             # x stays f32 in HBM
    o_tile = _padded_tile_bytes(tb, d_out_pad, 4)
    weights = (_padded_tile_bytes(d_in, h_pad, 2) + _padded_tile_bytes(1, h_pad, 4)
               + _padded_tile_bytes(h_pad, d_out_pad, 2)
               + _padded_tile_bytes(1, d_out_pad, 4))
    interm = 3 * _padded_tile_bytes(tb, h_pad, 4)
    # Default pipelining double-buffers every operand; add intermediates.
    return 2 * (x_tile + o_tile + weights) + interm


def _tpu_generation():
    """Return (vmem_capacity_bytes, tensorcores_per_chip) with conservative
    fallbacks (assume v7x: 64 MiB VMEM, 2 TCs) if introspection fails."""
    vmem_cap = 64 * 2**20
    n_tc = 2
    try:
        info = pltpu.get_tpu_info()
        vmem_cap = int(getattr(info, "vmem_capacity_bytes", vmem_cap))
    except Exception:
        pass
    try:
        kind = jax.devices()[0].device_kind.lower()
        if ("v5" in kind) or ("v6" in kind):
            n_tc = 1                          # single TensorCore per chip
            vmem_cap = max(vmem_cap, 128 * 2**20)
    except Exception:
        pass
    return vmem_cap, n_tc


def _pick_batch_tile(batch, n_tc, d_in, h_pad, d_out_pad, vmem_cap):
    """Full batch on 1-TC chips (grid=(1,)); ~half batch per step on 2-TC chips.
    Shrinks by halving (multiples of 8) if the working set exceeds 3/4 of VMEM."""
    cap = (vmem_cap * 3) // 4
    if n_tc <= 1 or batch <= 8:
        tb = batch
    else:
        tb = min(batch, _ceil_to(pl.cdiv(batch, n_tc), 8))
    while tb > 8 and _vmem_need_bytes(tb, d_in, h_pad, d_out_pad) > cap:
        tb = _ceil_to(max(tb // 2, 8), 8)
    return tb, cap


# ---------------------------------------------------------------------------
# Forward pass
# ---------------------------------------------------------------------------
@functools.partial(jax.jit, static_argnames=("d_out",))
def simple_dnn_forward(x, w1_t, b1_2d, w2_t, b2_2d, *, d_out):
    """x: (B, D_in); params already in padded kernel layout (prepare_params)."""
    B, D_in = x.shape
    H_pad = w1_t.shape[1]
    D_pad = w2_t.shape[1]

    vmem_cap, n_tc = _tpu_generation()
    TB, cap = _pick_batch_tile(B, n_tc, D_in, H_pad, D_pad, vmem_cap)
    grid = (pl.cdiv(B, TB),)

    need = _vmem_need_bytes(TB, D_in, H_pad, D_pad)
    vmem_limit = int(min(max(2 * need, 16 * 2**20), cap))

    grid_spec = pl.GridSpec(
        grid=grid,
        in_specs=[
            pl.BlockSpec((TB, D_in), lambda i: (i, 0)),      # x tile streams
            pl.BlockSpec((D_in, H_pad), lambda i: (0, 0)),   # W1 resident
            pl.BlockSpec((1, H_pad), lambda i: (0, 0)),      # b1 resident
            pl.BlockSpec((H_pad, D_pad), lambda i: (0, 0)),  # W2 resident
            pl.BlockSpec((1, D_pad), lambda i: (0, 0)),      # b2 resident
        ],
        out_specs=pl.BlockSpec((TB, D_pad), lambda i: (i, 0)),
    )

    cost = pl.CostEstimate(
        flops=2 * B * (D_in * H_pad + H_pad * D_pad),
        transcendentals=2 * B * D_pad,                       # exp + reciprocal on EUP
        bytes_accessed=(B * D_in * 4 + D_in * H_pad * 2 + H_pad * 4
                        + H_pad * D_pad * 2 + D_pad * 4 + B * D_pad * 4),
    )

    out_pad = pl.pallas_call(
        mlp_kernel,
        out_shape=jax.ShapeDtypeStruct((B, D_pad), jnp.float32),
        grid_spec=grid_spec,
        compiler_params=pltpu.CompilerParams(
            dimension_semantics=("parallel",),               # megacore batch sharding
            vmem_limit_bytes=vmem_limit,
        ),
        cost_estimate=cost,
    )(x, w1_t, b1_2d, w2_t, b2_2d)

    # Kernel writes a lane-dense (B, D_pad) slab; slice the real outputs here.
    return out_pad[:, :d_out]


# ---------------------------------------------------------------------------
# Self-test
# ---------------------------------------------------------------------------
def _torch_linear_init(key, out_features, in_features):
    """Deterministic stand-in for PyTorch nn.Linear default init."""
    kw, kb = jax.random.split(key)
    bound = 1.0 / jnp.sqrt(jnp.float32(in_features))
    w = jax.random.uniform(kw, (out_features, in_features), jnp.float32,
                           minval=-bound, maxval=bound)
    b = jax.random.uniform(kb, (out_features,), jnp.float32,
                           minval=-bound, maxval=bound)
    return w, b


if __name__ == "__main__":
    # Small shapes consistent with the MLP; batch big enough that v7x's 2-step
    # grid actually engages while v5e/v6e still run a single grid step.
    batch, input_size, hidden_size, output_size = 256, 32, 64, 16

    key = jax.random.PRNGKey(0)
    kx, k1, k2 = jax.random.split(key, 3)

    x = jax.random.normal(kx, (batch, input_size), jnp.float32)
    w1, b1 = _torch_linear_init(k1, hidden_size, input_size)
    w2, b2 = _torch_linear_init(k2, output_size, hidden_size)

    # One-time layout conversion + zero padding (outside the per-call path).
    w1_t, b1_2d, w2_t, b2_2d, d_out = prepare_params(w1, b1, w2, b2)

    out = simple_dnn_forward(x, w1_t, b1_2d, w2_t, b2_2d, d_out=d_out)
    out = jax.block_until_ready(out)

    # Pure-JAX f32 reference of the same forward pass (bf16 MXU path + approx
    # reciprocal -> looser tolerance).  Also implicitly checks that the zero
    # padding of H / D_out does not perturb the sliced outputs.
    ref = jax.nn.sigmoid(jnp.maximum(x @ w1.T + b1, 0.0) @ w2.T + b2)
    assert out.shape == (batch, output_size), out.shape
    assert out.dtype == jnp.float32, out.dtype
    max_err = float(jnp.max(jnp.abs(out - ref)))
    assert jnp.allclose(out, ref, atol=2e-2, rtol=2e-2), max_err

    print("KERNEL_OK")
</pallas_src>

<mosaic_0001>
module attributes {stable_mosaic.version = 11 : i64} {
  func.func @mlp_kernel(%arg0: i32, %arg1: memref<128x32xf32, #tpu.memory_space<vmem>>, %arg2: memref<32x128xbf16, #tpu.memory_space<vmem>>, %arg3: memref<1x128xf32, #tpu.memory_space<vmem>>, %arg4: memref<128x128xbf16, #tpu.memory_space<vmem>>, %arg5: memref<1x128xf32, #tpu.memory_space<vmem>>, %arg6: memref<128x128xf32, #tpu.memory_space<vmem>>) attributes {dimension_semantics = [#tpu.dimension_semantics<parallel>], iteration_bounds = array<i64: 2>, scalar_prefetch = 0 : i64, scratch_operands = 0 : i64, tpu.core_type = #tpu.core_type<tc>, window_params = [{transform_indices = @transform_0, window_bounds = array<i64: 128, 32>}, {pipeline_mode = #tpu.pipeline_mode<synchronous>, transform_indices = @transform_1, window_bounds = array<i64: 32, 128>}, {pipeline_mode = #tpu.pipeline_mode<synchronous>, transform_indices = @transform_2, window_bounds = array<i64: 1, 128>}, {pipeline_mode = #tpu.pipeline_mode<synchronous>, transform_indices = @transform_3, window_bounds = array<i64: 128, 128>}, {pipeline_mode = #tpu.pipeline_mode<synchronous>, transform_indices = @transform_4, window_bounds = array<i64: 1, 128>}, {transform_indices = @transform_5, window_bounds = array<i64: 128, 128>}]} {
    %c0 = arith.constant 0 : index
    %c0_0 = arith.constant 0 : index
    %0 = vector.load %arg1[%c0, %c0_0] : memref<128x32xf32, #tpu.memory_space<vmem>>, vector<128x32xf32>
    %1 = arith.truncf %0 : vector<128x32xf32> to vector<128x32xbf16>
    %c0_1 = arith.constant 0 : index
    %c0_2 = arith.constant 0 : index
    %2 = vector.load %arg2[%c0_1, %c0_2] : memref<32x128xbf16, #tpu.memory_space<vmem>>, vector<32x128xbf16>
    %cst = arith.constant dense<0.000000e+00> : vector<128x128xf32>
    %3 = tpu.matmul %1, %2, %cst {dimension_numbers = #tpu.dot_dimension_numbers<[1], [0], [0], [1], [0, 0, 1, 1], [], []>} : vector<128x32xbf16>, vector<32x128xbf16>, vector<128x128xf32> -> vector<128x128xf32>
    %c0_3 = arith.constant 0 : index
    %c0_4 = arith.constant 0 : index
    %4 = vector.load %arg3[%c0_3, %c0_4] : memref<1x128xf32, #tpu.memory_space<vmem>>, vector<1x128xf32>
    %5 = vector.broadcast %4 : vector<1x128xf32> to vector<128x128xf32>
    %6 = arith.addf %3, %5 : vector<128x128xf32>
    %cst_5 = arith.constant 0.000000e+00 : f32
    %7 = vector.broadcast %cst_5 : f32 to vector<128x128xf32>
    %8 = arith.maximumf %6, %7 : vector<128x128xf32>
    %9 = arith.truncf %8 : vector<128x128xf32> to vector<128x128xbf16>
    %c0_6 = arith.constant 0 : index
    %c0_7 = arith.constant 0 : index
    %10 = vector.load %arg4[%c0_6, %c0_7] : memref<128x128xbf16, #tpu.memory_space<vmem>>, vector<128x128xbf16>
    %cst_8 = arith.constant dense<0.000000e+00> : vector<128x128xf32>
    %11 = tpu.matmul %9, %10, %cst_8 {dimension_numbers = #tpu.dot_dimension_numbers<[1], [0], [0], [1], [0, 0, 1, 1], [], []>} : vector<128x128xbf16>, vector<128x128xbf16>, vector<128x128xf32> -> vector<128x128xf32>
    %c0_9 = arith.constant 0 : index
    %c0_10 = arith.constant 0 : index
    %12 = vector.load %arg5[%c0_9, %c0_10] : memref<1x128xf32, #tpu.memory_space<vmem>>, vector<1x128xf32>
    %13 = vector.broadcast %12 : vector<1x128xf32> to vector<128x128xf32>
    %14 = arith.addf %11, %13 : vector<128x128xf32>
    %cst_11 = arith.constant 0.000000e+00 : f32
    %15 = vector.broadcast %cst_11 : f32 to vector<128x128xf32>
    %16 = arith.subf %15, %14 : vector<128x128xf32>
    %17 = math.exp %16 : vector<128x128xf32>
    %cst_12 = arith.constant 1.000000e+00 : f32
    %18 = vector.broadcast %cst_12 : f32 to vector<128x128xf32>
    %19 = arith.addf %18, %17 : vector<128x128xf32>
    %20 = tpu.reciprocal %19 {approx = true} : vector<128x128xf32> -> vector<128x128xf32>
    %c0_13 = arith.constant 0 : index
    %c0_14 = arith.constant 0 : index
    %21 = vector.load %arg6[%c0_13, %c0_14] : memref<128x128xf32, #tpu.memory_space<vmem>>, vector<128x128xf32>
    tpu.vector_store %arg6[%c0_13, %c0_14], %20 {strides = array<i32>} : memref<128x128xf32, #tpu.memory_space<vmem>>, vector<128x128xf32>,
    return
  }
  func.func @transform_0(%arg0: i32) -> (i32, i32) {
    %c0_i32 = arith.constant 0 : i32
    %c0_i32_0 = arith.constant 0 : i32
    return %arg0, %c0_i32 : i32, i32
  }
  func.func @transform_1(%arg0: i32) -> (i32, i32) {
    %c0_i32 = arith.constant 0 : i32
    %c0_i32_0 = arith.constant 0 : i32
    %c0_i32_1 = arith.constant 0 : i32
    return %c0_i32, %c0_i32_0 : i32, i32
  }
  func.func @transform_2(%arg0: i32) -> (i32, i32) {
    %c0_i32 = arith.constant 0 : i32
    %c0_i32_0 = arith.constant 0 : i32
    %c0_i32_1 = arith.constant 0 : i32
    return %c0_i32, %c0_i32_0 : i32, i32
  }
  func.func @transform_3(%arg0: i32) -> (i32, i32) {
    %c0_i32 = arith.constant 0 : i32
    %c0_i32_0 = arith.constant 0 : i32
    %c0_i32_1 = arith.constant 0 : i32
    return %c0_i32, %c0_i32_0 : i32, i32
  }
  func.func @transform_4(%arg0: i32) -> (i32, i32) {
    %c0_i32 = arith.constant 0 : i32
    %c0_i32_0 = arith.constant 0 : i32
    %c0_i32_1 = arith.constant 0 : i32
    return %c0_i32, %c0_i32_0 : i32, i32
  }
  func.func @transform_5(%arg0: i32) -> (i32, i32) {
    %c0_i32 = arith.constant 0 : i32
    %c0_i32_0 = arith.constant 0 : i32
    return %arg0, %c0_i32 : i32, i32
  }
}

</mosaic_0001>

<bundles_post_ra>
// kernel: simple_dnn_forward.1
= control target key start
LH: loop header
LB: loop body
LE: loop exit
PB: predicated region body
PF: predicated region fallthrough
CT: control target
= control target key end

     0   :  { %s831_s18 = smov 0   ;;  %s953_s0 = inlined_call_operand.vmem [shape: f32[256,32], index: 0, kind: input, shape index: {}]   ;;  %s954_s1 = inlined_call_operand.vmem [shape: bf16[32,128], index: 1, kind: input, shape index: {}]   ;;  %s955_s2 = inlined_call_operand.vmem [shape: f32[1,128], index: 2, kind: input, shape index: {}]   ;;  %s956_s3 = inlined_call_operand.vmem [shape: bf16[128,128], index: 3, kind: input, shape index: {}]   ;;  %s957_s4 = inlined_call_operand.vmem [shape: f32[1,128], index: 4, kind: input, shape index: {}]   ;;  %s958_s5 = inlined_call_operand.vmem [shape: f32[256,128], index: 5, kind: output, shape index: {}]  }
   0x1 LB: > { %s640_s19 = sadd.s32 4294967295, %s799_s18   ;;  %p644_p0 = scmp.ge.s32.totalorder %s799_s18, 1  ;;  %s799_s18 = sphi %s831_s18, %s15_s18  }
   0x2   : > { %p188_p1 = scmp.lt.s32.totalorder %s799_s18, 3 }
   0x4   : > { %p189_p2 = pnand %p644_p0, %p188_p1 }
   0x5   : > { %s645_s22 = sshll.u32 (!%p189_p2), %s640_s19, 4 }
   0x6   : > { %192 = sbr.rel (%p189_p2) target bundleno = 434 (0x1b2), region = 40  ;;  %p217_p3 = scmp.lt.s32.totalorder (!%p189_p2), %s645_s22, 31 }
   0xb   : > { %v700_v0 = vld [vmem:[%s954_s1 + $0x8] sm:$0xff]  ;;  %v699_v1 = vld [vmem:[%s954_s1] sm:$0xff]  ;;  %s960_s22 = smov (!%p217_p3, %s645_s22), 31  ;;  %vm273_vm0 = vcmask 261120   ;;  %v708_v14 = vld [vmem:[%s956_s3 + $0x38] sm:$0xff] }
   0xc   : > { %304 = vmatpush.bf16.msra.mxu0 %v700_v0  ;;  %709 = vmatpush.bf16.msra.mxu3 %v700_v0  ;;  %s646_s25 = sshll.u32 %s960_s22, 3  ;;  %v707_v15 = vld [vmem:[%s956_s3 + $0x30] sm:$0xff]  ;;  %v706_v16 = vld [vmem:[%s956_s3 + $0x28] sm:$0xff]  ;;  %v705_v22 = vld [vmem:[%s956_s3 + $0x20] sm:$0xff] }
   0xd   : > { %s853_s28 = scalar_lea.vmem %s953_s0, %s646_s25  ;;  %439 = vmatpush.bf16.msra.mxu1 %v708_v14  ;;  %711 = vmatpush.bf16.msra.mxu2 %v708_v14  ;;  %v704_v30 = vld [vmem:[%s956_s3 + $0x18] sm:$0xff]  ;;  %v703_v31 = vld [vmem:[%s956_s3 + $0x10] sm:$0xff]  ;;  %v702_v32 = vld [vmem:[%s956_s3 + $0x8] sm:$0xff]  ;;  %s919_s29 = scalar_lea.vmem %s958_s5, %s646_s25 }
   0xe   : > { %v229_v2 = vld [vmem:[%s853_s28] sm:$0xff]  ;;  %v230_v3 = vld [vmem:[%s853_s28 + $0x8] sm:$0xff]  ;;  %v231_v5 = vld [vmem:[%s853_s28 + $0x10] sm:$0xff] }
   0xf   : > { %v245_v4 = vpack.c.bf16 %v230_v3, %v229_v2  ;;  %v232_v6 = vld [vmem:[%s853_s28 + $0x18] sm:$0xff]  ;;  %v233_v8 = vld [vmem:[%s853_s28 + $0x20] sm:$0xff]  ;;  %v234_v9 = vld [vmem:[%s853_s28 + $0x28] sm:$0xff] }
  0x10   : > { %305 = vmatpush.bf16.msra.mxu0 %v699_v1  ;;  %710 = vmatpush.bf16.msra.mxu3 %v699_v1  ;;  %v246_v7 = vpack.c.bf16 %v232_v6, %v231_v5  ;;  %v247_v10 = vpack.c.bf16 %v234_v9, %v233_v8  ;;  %v239_v11 = vld [vmem:[%s853_s28 + $0x50] sm:$0xff]  ;;  %v240_v12 = vld [vmem:[%s853_s28 + $0x58] sm:$0xff]  ;;  %v241_v19 = vld [vmem:[%s853_s28 + $0x60] sm:$0xff] }
  0x11   : > { %v250_v13 = vpack.c.bf16 %v240_v12, %v239_v11  ;;  %440 = vmatpush.bf16.msra.mxu1 %v707_v15  ;;  %712 = vmatpush.bf16.msra.mxu2 %v707_v15  ;;  %v235_v17 = vld [vmem:[%s853_s28 + $0x30] sm:$0xff]  ;;  %v236_v18 = vld [vmem:[%s853_s28 + $0x38] sm:$0xff]  ;;  %v242_v20 = vld [vmem:[%s853_s28 + $0x68] sm:$0xff] }
  0x12   : > { %v248_v21 = vpack.c.bf16 %v236_v18, %v235_v17  ;;  %v251_v23 = vpack.c.bf16 %v242_v20, %v241_v19  ;;  %v237_v24 = vld [vmem:[%s853_s28 + $0x40] sm:$0xff]  ;;  %v238_v25 = vld [vmem:[%s853_s28 + $0x48] sm:$0xff]  ;;  %v243_v26 = vld [vmem:[%s853_s28 + $0x70] sm:$0xff] }
  0x13   : > { %657 = vmatmul.msk.bf16.vlgmr.msra.gmra.mxu0 %vm273_vm0, %v245_v4  ;;  %662 = vmatmul.msk.bf16.vlgmr.msra.gmra.mxu3 %vm273_vm0, %v250_v13  ;;  %v244_v27 = vld [vmem:[%s853_s28 + $0x78] sm:$0xff]  ;;  %v249_v28 = vpack.c.bf16 %v238_v25, %v237_v24  ;;  %v701_v33 = vld [vmem:[%s956_s3] sm:$0xff] }
  0x14   : > { %v252_v29 = vpack.c.bf16 %v244_v27, %v243_v26  ;;  %v727_v35 = vld [vmem:[%s955_s2] ss:$0 sm:$0xff] }
  0x15   : > { %441 = vmatpush.bf16.msra.mxu1 %v706_v16  ;;  %713 = vmatpush.bf16.msra.mxu2 %v706_v16  ;;  %v909_v27 = vld [vmem:[%s957_s4] ss:$0 sm:$0xff] }
  0x19   : > { %442 = vmatpush.bf16.msra.mxu1 %v705_v22  ;;  %714 = vmatpush.bf16.msra.mxu2 %v705_v22 }
  0x1d   : > { %443 = vmatpush.bf16.msra.mxu1 %v704_v30  ;;  %715 = vmatpush.bf16.msra.mxu2 %v704_v30 }
  0x21   : > { %444 = vmatpush.bf16.msra.mxu1 %v703_v31  ;;  %716 = vmatpush.bf16.msra.mxu2 %v703_v31 }
  0x23   : > { %658 = vmatmul.msk.bf16.gmra.mxu0 %vm273_vm0, %v246_v7  ;;  %663 = vmatmul.msk.bf16.gmra.mxu3 %vm273_vm0, %v251_v23 }
  0x25   : > { %445 = vmatpush.bf16.msra.mxu1 %v702_v32  ;;  %717 = vmatpush.bf16.msra.mxu2 %v702_v32 }
  0x29   : > { %446 = vmatpush.bf16.msra.mxu1 %v701_v33  ;;  %718 = vmatpush.bf16.msra.mxu2 %v701_v33 }
  0x33   : > { %659 = vmatmul.msk.bf16.gmra.mxu0 %vm273_vm0, %v247_v10  ;;  %664 = vmatmul.msk.bf16.gmra.mxu3 %vm273_vm0, %v252_v29 }
  0x43   : > { %660 = vmatmul.msk.bf16.gmra.mxu0 %vm273_vm0, %v248_v21 }
  0x53   : > { %661 = vmatmul.msk.bf16.gmra.mxu0 %vm273_vm0, %v249_v28 }
  0x90   : > { %v307_v34 = vpop.f32.mrf.mxu0 }
  0x91   : > { %v308_v36 = vadd.f32 %v727_v35, %v307_v34 }
  0x93   : > { %v347_v39 = vmax.f32 %v308_v36, 0.0 }
  0x96   : > { %v332_v0 = vpop.f32.mrf.mxu3 }
  0x97   : > { %v333_v9 = vadd.f32 %v727_v35, %v332_v0 }
  0x98   : > { %v309_v37 = vpop.f32.mrf.mxu0 }
  0x99   : > { %v310_v38 = vadd.f32 %v727_v35, %v309_v37  ;;  %v357_v11 = vmax.f32 %v333_v9, 0.0 }
  0x9b   : > { %v348_v40 = vmax.f32 %v310_v38, 0.0 }
  0x9d   : > { %v363_v41 = vpack.c.bf16 %v348_v40, %v347_v39 }
  0x9e   : > { %v334_v4 = vpop.f32.mrf.mxu3 }
  0x9f   : > { %447 = vmatmul.bf16.vlgmr.msra.gmra.mxu1 %v363_v41  ;;  %v335_v10 = vadd.f32 %v727_v35, %v334_v4 }
  0xa0   : > { %v312_v42 = vpop.f32.mrf.mxu0 }
  0xa1   : > { %v313_v43 = vadd.f32 %v727_v35, %v312_v42  ;;  %v358_v12 = vmax.f32 %v335_v10, 0.0 }
  0xa3   : > { %v349_v46 = vmax.f32 %v313_v43, 0.0  ;;  %v368_v13 = vpack.c.bf16 %v358_v12, %v357_v11 }
  0xa6   : > { %v337_v8 = vpop.f32.mrf.mxu3 }
  0xa7   : > { %v338_v15 = vadd.f32 %v727_v35, %v337_v8 }
  0xa8   : > { %v314_v44 = vpop.f32.mrf.mxu0 }
  0xa9   : > { %v315_v45 = vadd.f32 %v727_v35, %v314_v44  ;;  %v359_v18 = vmax.f32 %v338_v15, 0.0 }
  0xab   : > { %v350_v47 = vmax.f32 %v315_v45, 0.0 }
  0xad   : > { %v364_v48 = vpack.c.bf16 %v350_v47, %v349_v46 }
  0xae   : > { %v339_v14 = vpop.f32.mrf.mxu3 }
  0xaf   : > { %452 = vmatmul.bf16.gmra.mxu1 %v364_v48  ;;  %v340_v16 = vadd.f32 %v727_v35, %v339_v14 }
  0xb0   : > { %v317_v49 = vpop.f32.mrf.mxu0 }
  0xb1   : > { %v318_v50 = vadd.f32 %v727_v35, %v317_v49  ;;  %v360_v19 = vmax.f32 %v340_v16, 0.0 }
  0xb3   : > { %v351_v53 = vmax.f32 %v318_v50, 0.0  ;;  %v369_v20 = vpack.c.bf16 %v360_v19, %v359_v18 }
  0xb6   : > { %v342_v17 = vpop.f32.mrf.mxu3 }
  0xb7   : > { %v343_v22 = vadd.f32 %v727_v35, %v342_v17 }
  0xb8   : > { %v319_v51 = vpop.f32.mrf.mxu0 }
  0xb9   : > { %v320_v52 = vadd.f32 %v727_v35, %v319_v51  ;;  %v361_v24 = vmax.f32 %v343_v22, 0.0 }
  0xbb   : > { %v352_v54 = vmax.f32 %v320_v52, 0.0 }
  0xbd   : > { %v365_v55 = vpack.c.bf16 %v352_v54, %v351_v53 }
  0xbe   : > { %v344_v21 = vpop.f32.mrf.mxu3 }
  0xbf   : > { %457 = vmatmul.bf16.gmra.mxu1 %v365_v55  ;;  %v345_v23 = vadd.f32 %v727_v35, %v344_v21 }
  0xc0   : > { %v322_v56 = vpop.f32.mrf.mxu0 }
  0xc1   : > { %v323_v57 = vadd.f32 %v727_v35, %v322_v56  ;;  %v362_v25 = vmax.f32 %v345_v23, 0.0 }
  0xc3   : > { %v353_v60 = vmax.f32 %v323_v57, 0.0  ;;  %v370_v26 = vpack.c.bf16 %v362_v25, %v361_v24 }
  0xc8   : > { %v324_v58 = vpop.f32.mrf.mxu0 }
  0xc9   : > { %v325_v59 = vadd.f32 %v727_v35, %v324_v58 }
  0xcb   : > { %v354_v61 = vmax.f32 %v325_v59, 0.0 }
  0xcd   : > { %v366_v62 = vpack.c.bf16 %v354_v61, %v353_v60 }
  0xcf   : > { %462 = vmatmul.bf16.gmra.mxu1 %v366_v62 }
  0xd0   : > { %v327_v63 = vpop.f32.mrf.mxu0 }
  0xd1   : > { %v328_v1 = vadd.f32 %v727_v35, %v327_v63 }
  0xd3   : > { %v355_v5 = vmax.f32 %v328_v1, 0.0 }
  0xd8   : > { %v329_v2 = vpop.f32.mrf.mxu0 }
  0xd9   : > { %v330_v3 = vadd.f32 %v727_v35, %v329_v2 }
  0xdb   : > { %v356_v6 = vmax.f32 %v330_v3, 0.0 }
  0xdd   : > { %v367_v7 = vpack.c.bf16 %v356_v6, %v355_v5 }
  0xdf   : > { %467 = vmatmul.bf16.vlgmr.msra.gmra.mxu2 %v367_v7 }
  0xef   : > { %472 = vmatmul.bf16.gmra.mxu2 %v368_v13 }
  0xff   : > { %477 = vmatmul.bf16.gmra.mxu2 %v369_v20 }
 0x10f   : > { %482 = vmatmul.bf16.gmra.mxu2 %v370_v26 }
 0x11c   : > { %v448_v28 = vpop.f32.mrf.mxu1 }
 0x11d   : > { %v449_v29 = vadd.f32 %v909_v27, %v448_v28 }
 0x11f   : > { %v488_v30 = vsub.f32 0.0, %v449_v29 }
 0x121   : > { %v504_v31 = vmul.f32 1.442695, %v488_v30 }
 0x123   : > { %729 = vpow2.f32 %v504_v31 }
 0x124   : > { %v450_v32 = vpop.f32.mrf.mxu1 }
 0x125   : > { %v451_v33 = vadd.f32 %v909_v27, %v450_v32 }
 0x127   : > { %v489_v34 = vsub.f32 0.0, %v451_v33 }
 0x129   : > { %v730_v35 = vpop.eup %729  ;;  %v506_v36 = vmul.f32 1.442695, %v489_v34 }
 0x12a   : > { %v536_v37 = vadd.f32 1.0, %v730_v35 }
 0x12b   : > { %731 = vpow2.f32 %v506_v36 }
 0x12c   : > { %733 = vrcp.f32 %v536_v37  ;;  %v453_v38 = vpop.f32.mrf.mxu1 }
 0x12d   : > { %v454_v39 = vadd.f32 %v909_v27, %v453_v38 }
 0x12f   : > { %v490_v40 = vsub.f32 0.0, %v454_v39 }
 0x131   : > { %v732_v41 = vpop.eup %731  ;;  %v508_v42 = vmul.f32 1.442695, %v490_v40 }
 0x132   : > { %v734_v43 = vpop.eup %733  ;;  %v537_v44 = vadd.f32 1.0, %v732_v41 }
 0x133   : > { %568 = vst [vmem:[%s919_s29] sm:$0xff] %v734_v43  ;;  %735 = vpow2.f32 %v508_v42 }
 0x134   : > { %737 = vrcp.f32 %v537_v44  ;;  %v455_v45 = vpop.f32.mrf.mxu1 }
 0x135   : > { %v456_v46 = vadd.f32 %v909_v27, %v455_v45 }
 0x137   : > { %v491_v47 = vsub.f32 0.0, %v456_v46 }
 0x139   : > { %v736_v48 = vpop.eup %735  ;;  %v510_v49 = vmul.f32 1.442695, %v491_v47 }
 0x13a   : > { %v738_v50 = vpop.eup %737  ;;  %v538_v51 = vadd.f32 1.0, %v736_v48 }
 0x13b   : > { %569 = vst [vmem:[%s919_s29 + $0x8] sm:$0xff] %v738_v50  ;;  %739 = vpow2.f32 %v510_v49 }
 0x13c   : > { %741 = vrcp.f32 %v538_v51  ;;  %v458_v52 = vpop.f32.mrf.mxu1 }
 0x13d   : > { %v459_v53 = vadd.f32 %v909_v27, %v458_v52 }
 0x13f   : > { %v492_v54 = vsub.f32 0.0, %v459_v53 }
 0x141   : > { %v740_v55 = vpop.eup %739  ;;  %v512_v56 = vmul.f32 1.442695, %v492_v54 }
 0x142   : > { %v742_v57 = vpop.eup %741  ;;  %v539_v58 = vadd.f32 1.0, %v740_v55 }
 0x143   : > { %570 = vst [vmem:[%s919_s29 + $0x10] sm:$0xff] %v742_v57  ;;  %743 = vpow2.f32 %v512_v56 }
 0x144   : > { %745 = vrcp.f32 %v539_v58  ;;  %v460_v59 = vpop.f32.mrf.mxu1 }
 0x145   : > { %v461_v60 = vadd.f32 %v909_v27, %v460_v59 }
 0x147   : > { %v493_v61 = vsub.f32 0.0, %v461_v60 }
 0x149   : > { %v744_v62 = vpop.eup %743  ;;  %v514_v63 = vmul.f32 1.442695, %v493_v61 }
 0x14a   : > { %v746_v0 = vpop.eup %745  ;;  %v540_v1 = vadd.f32 1.0, %v744_v62 }
 0x14b   : > { %571 = vst [vmem:[%s919_s29 + $0x18] sm:$0xff] %v746_v0  ;;  %747 = vpow2.f32 %v514_v63 }
 0x14c   : > { %749 = vrcp.f32 %v540_v1  ;;  %v463_v2 = vpop.f32.mrf.mxu1 }
 0x14d   : > { %v464_v3 = vadd.f32 %v909_v27, %v463_v2 }
 0x14f   : > { %v494_v4 = vsub.f32 0.0, %v464_v3 }
 0x151   : > { %v748_v5 = vpop.eup %747  ;;  %v516_v6 = vmul.f32 1.442695, %v494_v4 }
 0x152   : > { %v750_v7 = vpop.eup %749  ;;  %v541_v8 = vadd.f32 1.0, %v748_v5 }
 0x153   : > { %572 = vst [vmem:[%s919_s29 + $0x20] sm:$0xff] %v750_v7  ;;  %751 = vpow2.f32 %v516_v6 }
 0x154   : > { %753 = vrcp.f32 %v541_v8  ;;  %v465_v9 = vpop.f32.mrf.mxu1 }
 0x155   : > { %v466_v10 = vadd.f32 %v909_v27, %v465_v9 }
 0x157   : > { %v495_v11 = vsub.f32 0.0, %v466_v10 }
 0x159   : > { %v752_v12 = vpop.eup %751  ;;  %v518_v13 = vmul.f32 1.442695, %v495_v11 }
 0x15a   : > { %v754_v14 = vpop.eup %753  ;;  %v542_v15 = vadd.f32 1.0, %v752_v12 }
 0x15b   : > { %573 = vst [vmem:[%s919_s29 + $0x28] sm:$0xff] %v754_v14  ;;  %755 = vpow2.f32 %v518_v13 }
 0x15c   : > { %757 = vrcp.f32 %v542_v15 }
 0x161   : > { %v756_v16 = vpop.eup %755 }
 0x162   : > { %v758_v17 = vpop.eup %757  ;;  %v543_v18 = vadd.f32 1.0, %v756_v16  ;;  %v468_v19 = vpop.f32.mrf.mxu2 }
 0x163   : > { %574 = vst [vmem:[%s919_s29 + $0x30] sm:$0xff] %v758_v17  ;;  %v469_v20 = vadd.f32 %v909_v27, %v468_v19 }
 0x164   : > { %759 = vrcp.f32 %v543_v18 }
 0x165   : > { %v496_v21 = vsub.f32 0.0, %v469_v20 }
 0x167   : > { %v520_v22 = vmul.f32 1.442695, %v496_v21 }
 0x169   : > { %761 = vpow2.f32 %v520_v22 }
 0x16a   : > { %v760_v23 = vpop.eup %759  ;;  %v470_v24 = vpop.f32.mrf.mxu2 }
 0x16b   : > { %575 = vst [vmem:[%s919_s29 + $0x38] sm:$0xff] %v760_v23  ;;  %v471_v25 = vadd.f32 %v909_v27, %v470_v24 }
 0x16d   : > { %v497_v26 = vsub.f32 0.0, %v471_v25 }
 0x16f   : > { %v762_v28 = vpop.eup %761  ;;  %v522_v29 = vmul.f32 1.442695, %v497_v26 }
 0x170   : > { %v544_v30 = vadd.f32 1.0, %v762_v28 }
 0x171   : > { %763 = vpow2.f32 %v522_v29 }
 0x172   : > { %765 = vrcp.f32 %v544_v30  ;;  %v473_v31 = vpop.f32.mrf.mxu2 }
 0x173   : > { %v474_v32 = vadd.f32 %v909_v27, %v473_v31 }
 0x175   : > { %v498_v33 = vsub.f32 0.0, %v474_v32 }
 0x177   : > { %v764_v34 = vpop.eup %763  ;;  %v524_v35 = vmul.f32 1.442695, %v498_v33 }
 0x178   : > { %v766_v36 = vpop.eup %765  ;;  %v545_v37 = vadd.f32 1.0, %v764_v34 }
 0x179   : > { %576 = vst [vmem:[%s919_s29 + $0x40] sm:$0xff] %v766_v36  ;;  %767 = vpow2.f32 %v524_v35 }
 0x17a   : > { %769 = vrcp.f32 %v545_v37  ;;  %v475_v38 = vpop.f32.mrf.mxu2 }
 0x17b   : > { %v476_v39 = vadd.f32 %v909_v27, %v475_v38 }
 0x17d   : > { %v499_v40 = vsub.f32 0.0, %v476_v39 }
 0x17f   : > { %v768_v41 = vpop.eup %767  ;;  %v526_v42 = vmul.f32 1.442695, %v499_v40 }
 0x180   : > { %v770_v43 = vpop.eup %769  ;;  %v546_v44 = vadd.f32 1.0, %v768_v41 }
 0x181   : > { %577 = vst [vmem:[%s919_s29 + $0x48] sm:$0xff] %v770_v43  ;;  %771 = vpow2.f32 %v526_v42 }
 0x182   : > { %773 = vrcp.f32 %v546_v44  ;;  %v478_v45 = vpop.f32.mrf.mxu2 }
 0x183   : > { %v479_v46 = vadd.f32 %v909_v27, %v478_v45 }
 0x185   : > { %v500_v47 = vsub.f32 0.0, %v479_v46 }
 0x187   : > { %v772_v48 = vpop.eup %771  ;;  %v528_v49 = vmul.f32 1.442695, %v500_v47 }
 0x188   : > { %v774_v50 = vpop.eup %773  ;;  %v547_v51 = vadd.f32 1.0, %v772_v48 }
 0x189   : > { %578 = vst [vmem:[%s919_s29 + $0x50] sm:$0xff] %v774_v50  ;;  %775 = vpow2.f32 %v528_v49 }
 0x18a   : > { %777 = vrcp.f32 %v547_v51  ;;  %v480_v52 = vpop.f32.mrf.mxu2 }
 0x18b   : > { %v481_v53 = vadd.f32 %v909_v27, %v480_v52 }
 0x18d   : > { %v501_v54 = vsub.f32 0.0, %v481_v53 }
 0x18f   : > { %v776_v55 = vpop.eup %775  ;;  %v530_v56 = vmul.f32 1.442695, %v501_v54 }
 0x190   : > { %v778_v57 = vpop.eup %777  ;;  %v548_v58 = vadd.f32 1.0, %v776_v55 }
 0x191   : > { %579 = vst [vmem:[%s919_s29 + $0x58] sm:$0xff] %v778_v57  ;;  %779 = vpow2.f32 %v530_v56 }
 0x192   : > { %781 = vrcp.f32 %v548_v58  ;;  %v483_v59 = vpop.f32.mrf.mxu2 }
 0x193   : > { %v484_v60 = vadd.f32 %v909_v27, %v483_v59 }
 0x195   : > { %v502_v61 = vsub.f32 0.0, %v484_v60 }
 0x197   : > { %v780_v62 = vpop.eup %779  ;;  %v532_v63 = vmul.f32 1.442695, %v502_v61 }
 0x198   : > { %v782_v0 = vpop.eup %781  ;;  %v549_v1 = vadd.f32 1.0, %v780_v62 }
 0x199   : > { %580 = vst [vmem:[%s919_s29 + $0x60] sm:$0xff] %v782_v0  ;;  %783 = vpow2.f32 %v532_v63 }
 0x19a   : > { %785 = vrcp.f32 %v549_v1  ;;  %v485_v2 = vpop.f32.mrf.mxu2 }
 0x19b   : > { %v486_v3 = vadd.f32 %v909_v27, %v485_v2 }
 0x19d   : > { %v503_v4 = vsub.f32 0.0, %v486_v3 }
 0x19f   : > { %v784_v5 = vpop.eup %783  ;;  %v534_v6 = vmul.f32 1.442695, %v503_v4 }
 0x1a0   : > { %v786_v7 = vpop.eup %785  ;;  %v550_v8 = vadd.f32 1.0, %v784_v5 }
 0x1a1   : > { %581 = vst [vmem:[%s919_s29 + $0x68] sm:$0xff] %v786_v7  ;;  %787 = vpow2.f32 %v534_v6 }
 0x1a2   : > { %789 = vrcp.f32 %v550_v8 }
 0x1a7   : > { %v788_v9 = vpop.eup %787 }
 0x1a8   : > { %v790_v10 = vpop.eup %789  ;;  %v551_v11 = vadd.f32 1.0, %v788_v9 }
 0x1a9   : > { %582 = vst [vmem:[%s919_s29 + $0x70] sm:$0xff] %v790_v10 }
 0x1aa   : > { %791 = vrcp.f32 %v551_v11 }
 0x1b0   : > { %v792_v12 = vpop.eup %791 }
 0x1b1   : > { %583 = vst [vmem:[%s919_s29 + $0x78] sm:$0xff] %v792_v12 }
 0x1b2 PF: > { %s15_s18 = sadd.s32 1, %s799_s18  }
 0x1b3   : > { %p12_p4 = scmp.ge.s32.totalorder %s15_s18, 4  }
 0x1b5   :  { %14 = sbr.rel (!%p12_p4) target bundleno = 1 (0x1), region = 70 }

</bundles_post_ra>
